<compile_context>
chip_gen: v7x
topology: tpu7x:2x2x1
jax: 0.10.0
libtpu: 0.0.40
codegen_flags: <defaults>
</compile_context>

<pallas_src>
import functools

import numpy as np
import jax
import jax.numpy as jnp
from jax import lax
from jax.experimental import pallas as pl
from jax.experimental.pallas import tpu as pltpu

_LANE = 128
# Rows per M tile.  256 keeps the demo grid multi-step; for production-size
# spectrograms bump toward 1024-2048 to amortize the ~0.35 us/step overhead
# while staying well under the 32 MiB scoped VMEM default (v7x total is 64 MiB).
_TM_TARGET = 256


def _round_up(x, m):
    return (x + m - 1) // m * m


def _largest_divisor_tile(total, target):
    """Largest divisor of `total` <= target that is a multiple of 8 (0 if none)."""
    for d in range(min(target, total), 7, -1):
        if total % d == 0 and d % 8 == 0:
            return d
    return 0


def _pad2d(x, rows, cols, dtype):
    r, c = x.shape
    return jnp.pad(x.astype(dtype), ((0, rows - r), (0, cols - c)))


# ------------------------------ Pallas kernels ------------------------------ #

def _matmul_bias_relu_kernel(x_ref, w_ref, b_ref, o_ref):
    # x: (TM, Kp) bf16, w: (Kp, Cp) bf16, b: (1, Cp) f32  ->  o: (TM, Cp)
    acc = jnp.dot(x_ref[...], w_ref[...], preferred_element_type=jnp.float32)
    o_ref[...] = jnp.maximum(acc + b_ref[...], 0.0).astype(o_ref.dtype)


def _conv_gap_kernel(x_ref, w_ref, b_ref, o_ref, acc_ref, *, inv_hw):
    # Fused stage-2 conv-as-matmul + bias + ReLU + per-image global average pool.
    # Grid: (image n ["parallel"], M-tile within that image m ["arbitrary"]).
    m = pl.program_id(1)

    @pl.when(m == 0)
    def _init():
        acc_ref[...] = jnp.zeros_like(acc_ref)

    tile = jnp.dot(x_ref[...], w_ref[...], preferred_element_type=jnp.float32)
    tile = jnp.maximum(tile + b_ref[...], 0.0)
    acc_ref[...] += jnp.sum(tile, axis=0, keepdims=True)[None]   # (1,1,Cp)

    @pl.when(m == pl.num_programs(1) - 1)
    def _finalize():
        o_ref[...] = (acc_ref[...] * inv_hw).astype(o_ref.dtype)


# ------------------------------- call wrappers ------------------------------ #

def _conv_matmul(xcol, w_col, b, *, out_dtype=jnp.bfloat16, tm_target=_TM_TARGET):
    """(M, K) x (K, Cout) + bias + ReLU, M-tiled, lane-padded, bf16 MXU / f32 acc."""
    M, K = xcol.shape
    _, cout = w_col.shape
    kp = _round_up(K, _LANE)
    cp = _round_up(cout, _LANE)
    tm = min(tm_target, _round_up(M, 8))
    mp = _round_up(M, tm)

    x_p = _pad2d(xcol, mp, kp, jnp.bfloat16)
    w_p = _pad2d(w_col, kp, cp, jnp.bfloat16)
    b_p = _pad2d(b.reshape(1, -1), 1, cp, jnp.float32)

    out = pl.pallas_call(
        _matmul_bias_relu_kernel,
        out_shape=jax.ShapeDtypeStruct((mp, cp), out_dtype),
        grid=(mp // tm,),
        in_specs=[
            pl.BlockSpec((tm, kp), lambda i: (i, 0)),
            pl.BlockSpec((kp, cp), lambda i: (0, 0)),
            pl.BlockSpec((1, cp), lambda i: (0, 0)),
        ],
        out_specs=pl.BlockSpec((tm, cp), lambda i: (i, 0)),
        compiler_params=pltpu.CompilerParams(dimension_semantics=("parallel",)),
        cost_estimate=pl.CostEstimate(
            flops=2 * mp * kp * cp,
            transcendentals=0,
            bytes_accessed=mp * kp * 2 + kp * cp * 2
            + mp * cp * np.dtype(out_dtype).itemsize,
        ),
    )(x_p, w_p, b_p)
    return out[:M, :cout]


def _conv_gap(xcol, w_col, b, n_images, hw, *, tm_target=_TM_TARGET):
    """Fused (N*HW, K) x (K, Cout) conv-matmul + bias + ReLU + per-image avg pool."""
    M, K = xcol.shape
    _, cout = w_col.shape
    assert M == n_images * hw
    tm = _largest_divisor_tile(hw, tm_target)   # must divide hw -> no bias-polluted pad rows
    if tm == 0:
        # Robust fallback: unfused Pallas conv, then a cheap JAX mean over HW.
        y = _conv_matmul(xcol, w_col, b, out_dtype=jnp.float32,
                         tm_target=tm_target)
        return jnp.mean(y.reshape(n_images, hw, cout), axis=1)

    kp = _round_up(K, _LANE)
    cp = _round_up(cout, _LANE)
    tiles_per_img = hw // tm

    x_p = _pad2d(xcol, M, kp, jnp.bfloat16)
    w_p = _pad2d(w_col, kp, cp, jnp.bfloat16)
    b_p = _pad2d(b.reshape(1, -1), 1, cp, jnp.float32)

    kernel = functools.partial(_conv_gap_kernel, inv_hw=1.0 / float(hw))
    out = pl.pallas_call(
        kernel,
        out_shape=jax.ShapeDtypeStruct((n_images, 1, cp), jnp.float32),
        grid=(n_images, tiles_per_img),
        in_specs=[
            pl.BlockSpec((tm, kp), lambda n, m: (n * tiles_per_img + m, 0)),
            pl.BlockSpec((kp, cp), lambda n, m: (0, 0)),
            pl.BlockSpec((1, cp), lambda n, m: (0, 0)),
        ],
        out_specs=pl.BlockSpec((1, 1, cp), lambda n, m: (n, 0, 0)),
        scratch_shapes=[pltpu.VMEM((1, 1, cp), jnp.float32)],
        compiler_params=pltpu.CompilerParams(
            dimension_semantics=("parallel", "arbitrary")),
        cost_estimate=pl.CostEstimate(
            flops=2 * M * kp * cp,
            transcendentals=0,
            bytes_accessed=M * kp * 2 + kp * cp * 2 + n_images * cp * 4,
        ),
    )(x_p, w_p, b_p)
    return out.reshape(n_images, cp)[:, :cout]


# --------------------------------- JAX glue --------------------------------- #

def _im2col(x_nhwc, ksize, stride, pad):
    N, H, W, C = x_nhwc.shape
    xp = jnp.pad(x_nhwc, ((0, 0), (pad, pad), (pad, pad), (0, 0)))
    Ho = (H + 2 * pad - ksize) // stride + 1
    Wo = (W + 2 * pad - ksize) // stride + 1
    cols = []
    for dy in range(ksize):
        for dx in range(ksize):
            cols.append(
                xp[:, dy:dy + stride * Ho:stride, dx:dx + stride * Wo:stride, :])
    xcol = jnp.concatenate(cols, axis=-1)           # [N, Ho, Wo, k*k*C]
    return xcol.reshape(N * Ho * Wo, ksize * ksize * C), Ho, Wo


def init_params(key, c_in=4, c1=16, c2=32):
    """Deterministic synthetic parameters (shapes mirror a tiny conv backbone)."""
    k1, k2, k3, k4 = jax.random.split(key, 4)
    return {
        "w1": jax.random.normal(k1, (3, 3, c_in, c1), jnp.float32) * 0.1,
        "b1": jax.random.normal(k2, (1, c1), jnp.float32) * 0.01,
        "w2": jax.random.normal(k3, (3, 3, c1, c2), jnp.float32) * 0.1,
        "b2": jax.random.normal(k4, (1, c2), jnp.float32) * 0.01,
    }


def music_bin_encoder_forward(params, x_nchw):
    """MusicBinEncoder.forward: conv stages + global avg pool -> [N, C_feat]."""
    x = jnp.transpose(x_nchw, (0, 2, 3, 1))         # NCHW -> NHWC
    N = x.shape[0]

    # Stage 1: 3x3 conv, stride 1, pad 1, bias, ReLU (tiled Pallas matmul).
    c1 = params["w1"].shape[-1]
    xcol, Ho, Wo = _im2col(x, ksize=3, stride=1, pad=1)
    y = _conv_matmul(xcol, params["w1"].reshape(-1, c1), params["b1"],
                     out_dtype=jnp.bfloat16)
    y = y.reshape(N, Ho, Wo, c1)

    # Stage 2: 3x3 conv, stride 2, pad 1, bias, ReLU + global average pool,
    # fused in a single Pallas kernel (num_classes=0, global_pool='avg').
    c2 = params["w2"].shape[-1]
    xcol2, Ho2, Wo2 = _im2col(y, ksize=3, stride=2, pad=1)
    feats = _conv_gap(xcol2, params["w2"].reshape(-1, c2), params["b2"],
                      n_images=N, hw=Ho2 * Wo2)
    return feats


def _ref_forward(params, x_nchw):
    """Pure-JAX fp32 reference for numerical validation."""
    x = jnp.transpose(x_nchw, (0, 2, 3, 1)).astype(jnp.float32)
    dn = ("NHWC", "HWIO", "NHWC")
    y = lax.conv_general_dilated(x, params["w1"], (1, 1), ((1, 1), (1, 1)),
                                 dimension_numbers=dn)
    y = jnp.maximum(y + params["b1"].reshape(1, 1, 1, -1), 0.0)
    z = lax.conv_general_dilated(y, params["w2"], (2, 2), ((1, 1), (1, 1)),
                                 dimension_numbers=dn)
    z = jnp.maximum(z + params["b2"].reshape(1, 1, 1, -1), 0.0)
    return jnp.mean(z, axis=(1, 2))


if __name__ == "__main__":
    key = jax.random.PRNGKey(0)
    kx, kp = jax.random.split(key)

    # Small shapes consistent with the module: batch=2, channels=4, spatial=16x16 (NCHW)
    x = jax.random.normal(kx, (2, 4, 16, 16), jnp.float32)
    params = init_params(kp, c_in=4, c1=16, c2=32)

    feats = jax.jit(music_bin_encoder_forward)(params, x)
    feats = jax.block_until_ready(feats)

    assert feats.shape == (2, 32), f"unexpected output shape {feats.shape}"
    assert feats.dtype == jnp.float32

    ref = _ref_forward(params, x)
    assert jnp.allclose(feats, ref, rtol=5e-2, atol=5e-2), (
        f"max abs diff {jnp.max(jnp.abs(feats - ref))}")
    print("KERNEL_OK")
</pallas_src>

<mosaic_0001>
module attributes {stable_mosaic.version = 11 : i64} {
  func.func @_matmul_bias_relu_kernel(%arg0: i32, %arg1: memref<256x128xbf16, #tpu.memory_space<vmem>>, %arg2: memref<128x128xbf16, #tpu.memory_space<vmem>>, %arg3: memref<1x128xf32, #tpu.memory_space<vmem>>, %arg4: memref<256x128xbf16, #tpu.memory_space<vmem>>) attributes {dimension_semantics = [#tpu.dimension_semantics<parallel>], iteration_bounds = array<i64: 2>, scalar_prefetch = 0 : i64, scratch_operands = 0 : i64, tpu.core_type = #tpu.core_type<tc>, window_params = [{transform_indices = @transform_0, window_bounds = array<i64: 256, 128>}, {pipeline_mode = #tpu.pipeline_mode<synchronous>, transform_indices = @transform_1, window_bounds = array<i64: 128, 128>}, {pipeline_mode = #tpu.pipeline_mode<synchronous>, transform_indices = @transform_2, window_bounds = array<i64: 1, 128>}, {transform_indices = @transform_3, window_bounds = array<i64: 256, 128>}]} {
    %c0 = arith.constant 0 : index
    %c0_0 = arith.constant 0 : index
    %0 = vector.load %arg1[%c0, %c0_0] : memref<256x128xbf16, #tpu.memory_space<vmem>>, vector<256x128xbf16>
    %c0_1 = arith.constant 0 : index
    %c0_2 = arith.constant 0 : index
    %1 = vector.load %arg2[%c0_1, %c0_2] : memref<128x128xbf16, #tpu.memory_space<vmem>>, vector<128x128xbf16>
    %cst = arith.constant dense<0.000000e+00> : vector<256x128xf32>
    %2 = tpu.matmul %0, %1, %cst {dimension_numbers = #tpu.dot_dimension_numbers<[1], [0], [0], [1], [0, 0, 1, 1], [], []>} : vector<256x128xbf16>, vector<128x128xbf16>, vector<256x128xf32> -> vector<256x128xf32>
    %c0_3 = arith.constant 0 : index
    %c0_4 = arith.constant 0 : index
    %3 = vector.load %arg3[%c0_3, %c0_4] : memref<1x128xf32, #tpu.memory_space<vmem>>, vector<1x128xf32>
    %4 = vector.broadcast %3 : vector<1x128xf32> to vector<256x128xf32>
    %5 = arith.addf %2, %4 : vector<256x128xf32>
    %cst_5 = arith.constant 0.000000e+00 : f32
    %6 = vector.broadcast %cst_5 : f32 to vector<256x128xf32>
    %7 = arith.maximumf %5, %6 : vector<256x128xf32>
    %8 = arith.truncf %7 : vector<256x128xf32> to vector<256x128xbf16>
    %c0_6 = arith.constant 0 : index
    %c0_7 = arith.constant 0 : index
    %9 = vector.load %arg4[%c0_6, %c0_7] : memref<256x128xbf16, #tpu.memory_space<vmem>>, vector<256x128xbf16>
    tpu.vector_store %arg4[%c0_6, %c0_7], %8 {strides = array<i32>} : memref<256x128xbf16, #tpu.memory_space<vmem>>, vector<256x128xbf16>,
    return
  }
  func.func @transform_0(%arg0: i32) -> (i32, i32) {
    %c0_i32 = arith.constant 0 : i32
    %c0_i32_0 = arith.constant 0 : i32
    return %arg0, %c0_i32 : i32, i32
  }
  func.func @transform_1(%arg0: i32) -> (i32, i32) {
    %c0_i32 = arith.constant 0 : i32
    %c0_i32_0 = arith.constant 0 : i32
    %c0_i32_1 = arith.constant 0 : i32
    return %c0_i32, %c0_i32_0 : i32, i32
  }
  func.func @transform_2(%arg0: i32) -> (i32, i32) {
    %c0_i32 = arith.constant 0 : i32
    %c0_i32_0 = arith.constant 0 : i32
    %c0_i32_1 = arith.constant 0 : i32
    return %c0_i32, %c0_i32_0 : i32, i32
  }
  func.func @transform_3(%arg0: i32) -> (i32, i32) {
    %c0_i32 = arith.constant 0 : i32
    %c0_i32_0 = arith.constant 0 : i32
    return %arg0, %c0_i32 : i32, i32
  }
}

module attributes {stable_mosaic.version = 11 : i64} {
  func.func @_conv_gap_kernel(%arg0: i32, %arg1: i32, %arg2: memref<64x256xbf16, #tpu.memory_space<vmem>>, %arg3: memref<256x128xbf16, #tpu.memory_space<vmem>>, %arg4: memref<1x128xf32, #tpu.memory_space<vmem>>, %arg5: memref<1x1x128xf32, #tpu.memory_space<vmem>>, %arg6: memref<1x1x128xf32, #tpu.memory_space<vmem>>) attributes {dimension_semantics = [#tpu.dimension_semantics<parallel>, #tpu.dimension_semantics<arbitrary>], iteration_bounds = array<i64: 2, 1>, scalar_prefetch = 0 : i64, scratch_operands = 1 : i64, tpu.core_type = #tpu.core_type<tc>, window_params = [{transform_indices = @transform_0, window_bounds = array<i64: 64, 256>}, {pipeline_mode = #tpu.pipeline_mode<synchronous>, transform_indices = @transform_1, window_bounds = array<i64: 256, 128>}, {pipeline_mode = #tpu.pipeline_mode<synchronous>, transform_indices = @transform_2, window_bounds = array<i64: 1, 128>}, {transform_indices = @transform_3, window_bounds = array<i64: 1, 1, 128>}]} {
    %c0_i32 = arith.constant 0 : i32
    %0 = arith.cmpi eq, %arg1, %c0_i32 : i32
    %1 = arith.extui %0 : i1 to i32
    %c0_i32_0 = arith.constant 0 : i32
    %2 = arith.cmpi ne, %1, %c0_i32_0 : i32
    scf.if %2 {
      %cst_16 = arith.constant 0.000000e+00 : f32
      %20 = vector.broadcast %cst_16 : f32 to vector<1x1x128xf32>
      %c0_17 = arith.constant 0 : index
      %c0_18 = arith.constant 0 : index
      %c0_19 = arith.constant 0 : index
      %21 = vector.load %arg6[%c0_17, %c0_18, %c0_19] : memref<1x1x128xf32, #tpu.memory_space<vmem>>, vector<1x1x128xf32>
      tpu.vector_store %arg6[%c0_17, %c0_18, %c0_19], %20 {strides = array<i32>} : memref<1x1x128xf32, #tpu.memory_space<vmem>>, vector<1x1x128xf32>,
    } else {
    }
    %c0 = arith.constant 0 : index
    %c0_1 = arith.constant 0 : index
    %3 = vector.load %arg2[%c0, %c0_1] : memref<64x256xbf16, #tpu.memory_space<vmem>>, vector<64x256xbf16>
    %c0_2 = arith.constant 0 : index
    %c0_3 = arith.constant 0 : index
    %4 = vector.load %arg3[%c0_2, %c0_3] : memref<256x128xbf16, #tpu.memory_space<vmem>>, vector<256x128xbf16>
    %cst = arith.constant dense<0.000000e+00> : vector<64x128xf32>
    %5 = tpu.matmul %3, %4, %cst {dimension_numbers = #tpu.dot_dimension_numbers<[1], [0], [0], [1], [0, 0, 1, 1], [], []>} : vector<64x256xbf16>, vector<256x128xbf16>, vector<64x128xf32> -> vector<64x128xf32>
    %c0_4 = arith.constant 0 : index
    %c0_5 = arith.constant 0 : index
    %6 = vector.load %arg4[%c0_4, %c0_5] : memref<1x128xf32, #tpu.memory_space<vmem>>, vector<1x128xf32>
    %7 = vector.broadcast %6 : vector<1x128xf32> to vector<64x128xf32>
    %8 = arith.addf %5, %7 : vector<64x128xf32>
    %cst_6 = arith.constant 0.000000e+00 : f32
    %9 = vector.broadcast %cst_6 : f32 to vector<64x128xf32>
    %10 = arith.maximumf %8, %9 : vector<64x128xf32>
    %c0_7 = arith.constant 0 : index
    %c0_8 = arith.constant 0 : index
    %c0_9 = arith.constant 0 : index
    %11 = vector.load %arg6[%c0_7, %c0_8, %c0_9] : memref<1x1x128xf32, #tpu.memory_space<vmem>>, vector<1x1x128xf32>
    %cst_10 = arith.constant dense<0.000000e+00> : vector<128xf32>
    %12 = vector.multi_reduction <add>, %10, %cst_10 [0] : vector<64x128xf32> to vector<128xf32>
    %13 = vector.shape_cast %12 : vector<128xf32> to vector<1x128xf32>
    %14 = vector.shape_cast %13 : vector<1x128xf32> to vector<1x1x128xf32>
    %15 = arith.addf %11, %14 : vector<1x1x128xf32>
    %c0_11 = arith.constant 0 : index
    %c0_12 = arith.constant 0 : index
    %c0_13 = arith.constant 0 : index
    %16 = vector.load %arg6[%c0_11, %c0_12, %c0_13] : memref<1x1x128xf32, #tpu.memory_space<vmem>>, vector<1x1x128xf32>
    tpu.vector_store %arg6[%c0_11, %c0_12, %c0_13], %15 {strides = array<i32>} : memref<1x1x128xf32, #tpu.memory_space<vmem>>, vector<1x1x128xf32>,
    %c0_i32_14 = arith.constant 0 : i32
    %17 = arith.cmpi eq, %arg1, %c0_i32_14 : i32
    %18 = arith.extui %17 : i1 to i32
    %c0_i32_15 = arith.constant 0 : i32
    %19 = arith.cmpi ne, %18, %c0_i32_15 : i32
    scf.if %19 {
      %c0_16 = arith.constant 0 : index
      %c0_17 = arith.constant 0 : index
      %c0_18 = arith.constant 0 : index
      %20 = vector.load %arg6[%c0_16, %c0_17, %c0_18] : memref<1x1x128xf32, #tpu.memory_space<vmem>>, vector<1x1x128xf32>
      %cst_19 = arith.constant 1.562500e-02 : f32
      %21 = vector.broadcast %cst_19 : f32 to vector<1x1x128xf32>
      %22 = arith.mulf %20, %21 : vector<1x1x128xf32>
      %c0_20 = arith.constant 0 : index
      %c0_21 = arith.constant 0 : index
      %c0_22 = arith.constant 0 : index
      %23 = vector.load %arg5[%c0_20, %c0_21, %c0_22] : memref<1x1x128xf32, #tpu.memory_space<vmem>>, vector<1x1x128xf32>
      tpu.vector_store %arg5[%c0_20, %c0_21, %c0_22], %22 {strides = array<i32>} : memref<1x1x128xf32, #tpu.memory_space<vmem>>, vector<1x1x128xf32>,
    } else {
    }
    return
  }
  func.func @transform_0(%arg0: i32, %arg1: i32) -> (i32, i32) {
    %c1_i32 = arith.constant 1 : i32
    %0 = arith.muli %arg0, %c1_i32 : i32
    %1 = arith.addi %0, %arg1 : i32
    %c0_i32 = arith.constant 0 : i32
    %c0_i32_0 = arith.constant 0 : i32
    return %1, %c0_i32 : i32, i32
  }
  func.func @transform_1(%arg0: i32, %arg1: i32) -> (i32, i32) {
    %c0_i32 = arith.constant 0 : i32
    %c0_i32_0 = arith.constant 0 : i32
    %c0_i32_1 = arith.constant 0 : i32
    return %c0_i32, %c0_i32_0 : i32, i32
  }
  func.func @transform_2(%arg0: i32, %arg1: i32) -> (i32, i32) {
    %c0_i32 = arith.constant 0 : i32
    %c0_i32_0 = arith.constant 0 : i32
    %c0_i32_1 = arith.constant 0 : i32
    return %c0_i32, %c0_i32_0 : i32, i32
  }
  func.func @transform_3(%arg0: i32, %arg1: i32) -> (i32, i32, i32) {
    %c0_i32 = arith.constant 0 : i32
    %c0_i32_0 = arith.constant 0 : i32
    %c0_i32_1 = arith.constant 0 : i32
    return %arg0, %c0_i32, %c0_i32_0 : i32, i32, i32
  }
}

</mosaic_0001>

<bundles_post_ra>
// kernel: music_bin_encoder_forward.2
= control target key start
LH: loop header
LB: loop body
LE: loop exit
PB: predicated region body
PF: predicated region fallthrough
CT: control target
= control target key end

     0   :  { %s1126_s12 = smov 0   ;;  %s1247_s0 = inlined_call_operand.vmem [shape: bf16[512,128], index: 0, kind: input, shape index: {}]   ;;  %s1248_s1 = inlined_call_operand.vmem [shape: bf16[128,128], index: 1, kind: input, shape index: {}]   ;;  %s1249_s2 = inlined_call_operand.vmem [shape: f32[1,128], index: 2, kind: input, shape index: {}]   ;;  %s1250_s3 = inlined_call_operand.vmem [shape: bf16[512,128], index: 3, kind: output, shape index: {}]  }
   0x1 LB: > { %s783_s13 = sadd.s32 4294967295, %s1104_s12   ;;  %p787_p0 = scmp.ge.s32.totalorder %s1104_s12, 1  ;;  %s1104_s12 = sphi %s1126_s12, %s13_s12  }
   0x2   : > { %p138_p1 = scmp.lt.s32.totalorder %s1104_s12, 3 }
   0x4   : > { %p139_p2 = pnand %p787_p0, %p138_p1 }
   0x5   : > { %v1074_v0 = vld [vmem:[%s1248_s1] sm:$0xff] (!%p139_p2)   ;;  %s788_s16 = sshll.u32 (!%p139_p2), %s783_s13, 5  ;;  %v1075_v1 = vld [vmem:[%s1248_s1 + $0x8] sm:$0xff] (!%p139_p2)   ;;  %v1076_v2 = vld [vmem:[%s1248_s1 + $0x10] sm:$0xff] (!%p139_p2)  }
   0x6   : > { %142 = sbr.rel (%p139_p2) target bundleno = 284 (0x11c), region = 32  ;;  %p163_p3 = scmp.lt.s32.totalorder (!%p139_p2), %s788_s16, 63  ;;  %1002 = vmatprep.subr.bf16.mxu0 (!%p139_p2), %v1074_v0  ;;  %1050 = vmatprep.subr.bf16.mxu1 (!%p139_p2), %v1074_v0  ;;  %v1077_v3 = vld [vmem:[%s1248_s1 + $0x18] sm:$0xff] (!%p139_p2)   ;;  %v1078_v6 = vld [vmem:[%s1248_s1 + $0x20] sm:$0xff] (!%p139_p2)   ;;  %v1079_v7 = vld [vmem:[%s1248_s1 + $0x28] sm:$0xff] (!%p139_p2)  }
   0x7   : > { %1003 = vmatpush3.bf16.msra.mxu0 (!%p139_p2), %v1074_v0  ;;  %1058 = vmatpush3.bf16.msra.mxu1 (!%p139_p2), %v1074_v0  ;;  %v1080_v8 = vld [vmem:[%s1248_s1 + $0x30] sm:$0xff] (!%p139_p2)   ;;  %v1081_v9 = vld [vmem:[%s1248_s1 + $0x38] sm:$0xff] (!%p139_p2)   ;;  %v1187_v24 = vld [vmem:[%s1249_s2] ss:$0 sm:$0xff] (!%p139_p2) }
   0x8   : > { %1004 = vmatprep.subr.bf16.mxu0 (!%p139_p2), %v1075_v1  ;;  %1051 = vmatprep.subr.bf16.mxu1 (!%p139_p2), %v1075_v1 }
   0xb   : > { %1005 = vmatpush3.bf16.msra.mxu0 (!%p139_p2), %v1075_v1  ;;  %1059 = vmatpush3.bf16.msra.mxu1 (!%p139_p2), %v1075_v1 }
   0xc   : > { %1006 = vmatprep.subr.bf16.mxu0 (!%p139_p2), %v1076_v2  ;;  %1052 = vmatprep.subr.bf16.mxu1 (!%p139_p2), %v1076_v2 }
   0xd   : > { %s1252_s16 = smov (!%p163_p3, %s788_s16), 63 }
   0xe   : > { %s789_s21 = sshll.u32 %s1252_s16, 2 }
   0xf   : > { %s1151_s24 = scalar_lea.vmem %s1247_s0, %s789_s21  ;;  %1007 = vmatpush3.bf16.msra.mxu0 %v1076_v2  ;;  %1060 = vmatpush3.bf16.msra.mxu1 %v1076_v2  ;;  %s1202_s13 = scalar_lea.vmem %s1250_s3, %s789_s21 }
  0x10   : > { %v1082_v4 = vld [vmem:[%s1151_s24] sm:$0xff]   ;;  %1008 = vmatprep.subr.bf16.mxu0 %v1077_v3  ;;  %1053 = vmatprep.subr.bf16.mxu1 %v1077_v3  ;;  %v1084_v10 = vld [vmem:[%s1151_s24 + $0x8] sm:$0xff]   ;;  %v1086_v12 = vld [vmem:[%s1151_s24 + $0x10] sm:$0xff]  }
  0x11   : > { %v1083_v5 = vld [vmem:[%s1151_s24 + $0x40] sm:$0xff]   ;;  %1018 = vmatprep.mubr.bf16.mxu0 %v1082_v4  ;;  %v1085_v11 = vld [vmem:[%s1151_s24 + $0x48] sm:$0xff]   ;;  %v1087_v13 = vld [vmem:[%s1151_s24 + $0x50] sm:$0xff]  }
  0x12   : > { %1034 = vmatprep.mubr.bf16.mxu1 %v1083_v5  ;;  %v1088_v14 = vld [vmem:[%s1151_s24 + $0x18] sm:$0xff]   ;;  %v1090_v16 = vld [vmem:[%s1151_s24 + $0x20] sm:$0xff]   ;;  %v1092_v18 = vld [vmem:[%s1151_s24 + $0x28] sm:$0xff]  }
  0x13   : > { %1009 = vmatpush3.bf16.msra.mxu0 %v1077_v3  ;;  %1061 = vmatpush3.bf16.msra.mxu1 %v1077_v3  ;;  %v1089_v15 = vld [vmem:[%s1151_s24 + $0x58] sm:$0xff]   ;;  %v1091_v17 = vld [vmem:[%s1151_s24 + $0x60] sm:$0xff]   ;;  %v1093_v19 = vld [vmem:[%s1151_s24 + $0x68] sm:$0xff]  }
  0x14   : > { %1010 = vmatprep.subr.bf16.mxu0 %v1078_v6  ;;  %1054 = vmatprep.subr.bf16.mxu1 %v1078_v6  ;;  %v1094_v20 = vld [vmem:[%s1151_s24 + $0x30] sm:$0xff]   ;;  %v1096_v22 = vld [vmem:[%s1151_s24 + $0x38] sm:$0xff]  }
  0x15   : > { %v1095_v21 = vld [vmem:[%s1151_s24 + $0x70] sm:$0xff]   ;;  %v1097_v23 = vld [vmem:[%s1151_s24 + $0x78] sm:$0xff]  }
  0x17   : > { %1011 = vmatpush3.bf16.msra.mxu0 %v1078_v6  ;;  %1062 = vmatpush3.bf16.msra.mxu1 %v1078_v6 }
  0x18   : > { %1012 = vmatprep.subr.bf16.mxu0 %v1079_v7  ;;  %1055 = vmatprep.subr.bf16.mxu1 %v1079_v7 }
  0x1b   : > { %1013 = vmatpush3.bf16.msra.mxu0 %v1079_v7  ;;  %1063 = vmatpush3.bf16.msra.mxu1 %v1079_v7 }
  0x1c   : > { %1014 = vmatprep.subr.bf16.mxu0 %v1080_v8  ;;  %1056 = vmatprep.subr.bf16.mxu1 %v1080_v8 }
  0x1f   : > { %1015 = vmatpush3.bf16.msra.mxu0 %v1080_v8  ;;  %1064 = vmatpush3.bf16.msra.mxu1 %v1080_v8 }
  0x20   : > { %1016 = vmatprep.subr.bf16.mxu0 %v1081_v9  ;;  %1057 = vmatprep.subr.bf16.mxu1 %v1081_v9 }
  0x23   : > { %1017 = vmatpush3.bf16.msra.mxu0 %v1081_v9  ;;  %1065 = vmatpush3.bf16.msra.mxu1 %v1081_v9 }
  0x26   : > { %1019 = vmatmul.mubr.bf16.vlgmr.msra.gmra.mrb[0].mxu0 %v1084_v10  ;;  %1035 = vmatmul.mubr.bf16.vlgmr.msra.gmra.mrb[0].mxu1 %v1085_v11 }
  0x27   : > { %1022 = vmatprep.mubr.bf16.mxu0 %v1086_v12  ;;  %1038 = vmatprep.mubr.bf16.mxu1 %v1087_v13 }
  0x2e   : > { %1023 = vmatmul.mubr.bf16.gmra.mrb[4].mxu0 %v1088_v14  ;;  %1039 = vmatmul.mubr.bf16.gmra.mrb[4].mxu1 %v1089_v15 }
  0x2f   : > { %1026 = vmatprep.mubr.bf16.mxu0 %v1090_v16  ;;  %1042 = vmatprep.mubr.bf16.mxu1 %v1091_v17 }
  0x36   : > { %1027 = vmatmul.mubr.bf16.gmra.mrb[8].mxu0 %v1092_v18  ;;  %1043 = vmatmul.mubr.bf16.gmra.mrb[8].mxu1 %v1093_v19 }
  0x37   : > { %1030 = vmatprep.mubr.bf16.mxu0 %v1094_v20  ;;  %1046 = vmatprep.mubr.bf16.mxu1 %v1095_v21 }
  0x3e   : > { %1031 = vmatmul.mubr.bf16.gmra.mrb[12].mxu0 %v1096_v22  ;;  %1047 = vmatmul.mubr.bf16.gmra.mrb[12].mxu1 %v1097_v23 }
  0xf9   : > { %v1020_v25 = vpop.f32.mrb[0].mxu0  ;;  %v1036_v26 = vpop.f32.mrb[0].mxu1 }
  0xfa   : > { %v417_v27 = vadd.f32 %v1020_v25, %v1187_v24  ;;  %v481_v28 = vadd.f32 %v1036_v26, %v1187_v24  ;;  %v408_v29 = vpop.f32.mrb[1].mxu0  ;;  %v472_v30 = vpop.f32.mrb[1].mxu1 }
  0xfb   : > { %v409_v31 = vadd.f32 %v1187_v24, %v408_v29  ;;  %v473_v32 = vadd.f32 %v1187_v24, %v472_v30  ;;  %v1021_v33 = vpop.f32.mrb[2].mxu0  ;;  %v1037_v34 = vpop.f32.mrb[2].mxu1 }
  0xfc   : > { %v420_v35 = vadd.f32 %v1021_v33, %v1187_v24  ;;  %v484_v36 = vadd.f32 %v1037_v34, %v1187_v24  ;;  %v411_v37 = vpop.f32.mrb[3].mxu0  ;;  %v475_v38 = vpop.f32.mrb[3].mxu1  ;;  %v537_v41 = vmax.f32 %v417_v27, 0.0  ;;  %v553_v42 = vmax.f32 %v481_v28, 0.0 }
  0xfd   : > { %v412_v39 = vadd.f32 %v1187_v24, %v411_v37  ;;  %v476_v40 = vadd.f32 %v1187_v24, %v475_v38  ;;  %v535_v45 = vmax.f32 %v409_v31, 0.0  ;;  %v551_v46 = vmax.f32 %v473_v32, 0.0 }
  0xfe   : > { %v538_v43 = vmax.f32 %v420_v35, 0.0  ;;  %v554_v44 = vmax.f32 %v484_v36, 0.0 }
  0xff   : > { %v536_v47 = vmax.f32 %v412_v39, 0.0  ;;  %v552_v48 = vmax.f32 %v476_v40, 0.0 }
 0x100   : > { %v891_v49 = vpack.c.bf16 %v538_v43, %v537_v41  ;;  %v931_v50 = vpack.c.bf16 %v554_v44, %v553_v42 }
 0x101   : > { %v886_v51 = vpack.c.bf16 %v536_v47, %v535_v45  ;;  %v926_v52 = vpack.c.bf16 %v552_v48, %v551_v46  ;;  %v1024_v53 = vpop.f32.mrb[4].mxu0  ;;  %v1040_v54 = vpop.f32.mrb[4].mxu1 }
 0x102   : > { %963 = vst [vmem:[%s1202_s13 + $0x8] sm:$0xff] %v891_v49   ;;  %971 = vst [vmem:[%s1202_s13 + $0x48] sm:$0xff] %v931_v50   ;;  %v433_v55 = vadd.f32 %v1024_v53, %v1187_v24  ;;  %v497_v56 = vadd.f32 %v1040_v54, %v1187_v24  ;;  %v424_v57 = vpop.f32.mrb[5].mxu0  ;;  %v488_v58 = vpop.f32.mrb[5].mxu1 }
 0x103   : > { %887 = vst [vmem:[%s1202_s13] sm:$0xff] %v886_v51   ;;  %970 = vst [vmem:[%s1202_s13 + $0x40] sm:$0xff] %v926_v52   ;;  %v425_v59 = vadd.f32 %v1187_v24, %v424_v57  ;;  %v489_v60 = vadd.f32 %v1187_v24, %v488_v58  ;;  %v1025_v61 = vpop.f32.mrb[6].mxu0  ;;  %v1041_v62 = vpop.f32.mrb[6].mxu1 }
 0x104   : > { %v436_v63 = vadd.f32 %v1025_v61, %v1187_v24  ;;  %v500_v0 = vadd.f32 %v1041_v62, %v1187_v24  ;;  %v427_v1 = vpop.f32.mrb[7].mxu0  ;;  %v491_v2 = vpop.f32.mrb[7].mxu1  ;;  %v541_v5 = vmax.f32 %v433_v55, 0.0  ;;  %v557_v6 = vmax.f32 %v497_v56, 0.0 }
 0x105   : > { %v428_v3 = vadd.f32 %v1187_v24, %v427_v1  ;;  %v492_v4 = vadd.f32 %v1187_v24, %v491_v2  ;;  %v539_v9 = vmax.f32 %v425_v59, 0.0  ;;  %v555_v10 = vmax.f32 %v489_v60, 0.0 }
 0x106   : > { %v542_v7 = vmax.f32 %v436_v63, 0.0  ;;  %v558_v8 = vmax.f32 %v500_v0, 0.0 }
 0x107   : > { %v540_v11 = vmax.f32 %v428_v3, 0.0  ;;  %v556_v12 = vmax.f32 %v492_v4, 0.0 }
 0x108   : > { %v901_v13 = vpack.c.bf16 %v542_v7, %v541_v5  ;;  %v941_v14 = vpack.c.bf16 %v558_v8, %v557_v6 }
 0x109   : > { %v896_v15 = vpack.c.bf16 %v540_v11, %v539_v9  ;;  %v936_v16 = vpack.c.bf16 %v556_v12, %v555_v10  ;;  %v1028_v17 = vpop.f32.mrb[8].mxu0  ;;  %v1044_v18 = vpop.f32.mrb[8].mxu1 }
 0x10a   : > { %965 = vst [vmem:[%s1202_s13 + $0x18] sm:$0xff] %v901_v13   ;;  %973 = vst [vmem:[%s1202_s13 + $0x58] sm:$0xff] %v941_v14   ;;  %v449_v19 = vadd.f32 %v1028_v17, %v1187_v24  ;;  %v513_v20 = vadd.f32 %v1044_v18, %v1187_v24  ;;  %v440_v21 = vpop.f32.mrb[9].mxu0  ;;  %v504_v22 = vpop.f32.mrb[9].mxu1 }
 0x10b   : > { %964 = vst [vmem:[%s1202_s13 + $0x10] sm:$0xff] %v896_v15   ;;  %972 = vst [vmem:[%s1202_s13 + $0x50] sm:$0xff] %v936_v16   ;;  %v441_v23 = vadd.f32 %v1187_v24, %v440_v21  ;;  %v505_v25 = vadd.f32 %v1187_v24, %v504_v22  ;;  %v1029_v26 = vpop.f32.mrb[10].mxu0  ;;  %v1045_v27 = vpop.f32.mrb[10].mxu1 }
 0x10c   : > { %v452_v28 = vadd.f32 %v1029_v26, %v1187_v24  ;;  %v516_v29 = vadd.f32 %v1045_v27, %v1187_v24  ;;  %v443_v30 = vpop.f32.mrb[11].mxu0  ;;  %v507_v31 = vpop.f32.mrb[11].mxu1  ;;  %v545_v34 = vmax.f32 %v449_v19, 0.0  ;;  %v561_v35 = vmax.f32 %v513_v20, 0.0 }
 0x10d   : > { %v444_v32 = vadd.f32 %v1187_v24, %v443_v30  ;;  %v508_v33 = vadd.f32 %v1187_v24, %v507_v31  ;;  %v543_v38 = vmax.f32 %v441_v23, 0.0  ;;  %v559_v39 = vmax.f32 %v505_v25, 0.0 }
 0x10e   : > { %v546_v36 = vmax.f32 %v452_v28, 0.0  ;;  %v562_v37 = vmax.f32 %v516_v29, 0.0 }
 0x10f   : > { %v544_v40 = vmax.f32 %v444_v32, 0.0  ;;  %v560_v41 = vmax.f32 %v508_v33, 0.0 }
 0x110   : > { %v911_v42 = vpack.c.bf16 %v546_v36, %v545_v34  ;;  %v951_v43 = vpack.c.bf16 %v562_v37, %v561_v35 }
 0x111   : > { %v906_v44 = vpack.c.bf16 %v544_v40, %v543_v38  ;;  %v946_v45 = vpack.c.bf16 %v560_v41, %v559_v39  ;;  %v1032_v46 = vpop.f32.mrb[12].mxu0  ;;  %v1048_v47 = vpop.f32.mrb[12].mxu1 }
 0x112   : > { %967 = vst [vmem:[%s1202_s13 + $0x28] sm:$0xff] %v911_v42   ;;  %975 = vst [vmem:[%s1202_s13 + $0x68] sm:$0xff] %v951_v43   ;;  %v465_v48 = vadd.f32 %v1032_v46, %v1187_v24  ;;  %v529_v49 = vadd.f32 %v1048_v47, %v1187_v24  ;;  %v456_v50 = vpop.f32.mrb[13].mxu0  ;;  %v520_v51 = vpop.f32.mrb[13].mxu1 }
 0x113   : > { %966 = vst [vmem:[%s1202_s13 + $0x20] sm:$0xff] %v906_v44   ;;  %974 = vst [vmem:[%s1202_s13 + $0x60] sm:$0xff] %v946_v45   ;;  %v457_v52 = vadd.f32 %v1187_v24, %v456_v50  ;;  %v521_v53 = vadd.f32 %v1187_v24, %v520_v51  ;;  %v1033_v54 = vpop.f32.mrb[14].mxu0  ;;  %v1049_v55 = vpop.f32.mrb[14].mxu1 }
 0x114   : > { %v468_v56 = vadd.f32 %v1033_v54, %v1187_v24  ;;  %v532_v57 = vadd.f32 %v1049_v55, %v1187_v24  ;;  %v459_v58 = vpop.f32.mrb[15].mxu0  ;;  %v523_v59 = vpop.f32.mrb[15].mxu1  ;;  %v549_v62 = vmax.f32 %v465_v48, 0.0  ;;  %v565_v63 = vmax.f32 %v529_v49, 0.0 }
 0x115   : > { %v460_v60 = vadd.f32 %v1187_v24, %v459_v58  ;;  %v524_v61 = vadd.f32 %v1187_v24, %v523_v59  ;;  %v547_v2 = vmax.f32 %v457_v52, 0.0  ;;  %v563_v3 = vmax.f32 %v521_v53, 0.0 }
 0x116   : > { %v550_v0 = vmax.f32 %v468_v56, 0.0  ;;  %v566_v1 = vmax.f32 %v532_v57, 0.0 }
 0x117   : > { %v548_v4 = vmax.f32 %v460_v60, 0.0  ;;  %v564_v5 = vmax.f32 %v524_v61, 0.0 }
 0x118   : > { %v921_v6 = vpack.c.bf16 %v550_v0, %v549_v62  ;;  %v961_v7 = vpack.c.bf16 %v566_v1, %v565_v63 }
 0x119   : > { %v916_v8 = vpack.c.bf16 %v548_v4, %v547_v2  ;;  %v956_v9 = vpack.c.bf16 %v564_v5, %v563_v3 }
 0x11a   : > { %969 = vst [vmem:[%s1202_s13 + $0x38] sm:$0xff] %v921_v6   ;;  %977 = vst [vmem:[%s1202_s13 + $0x78] sm:$0xff] %v961_v7  }
 0x11b   : > { %968 = vst [vmem:[%s1202_s13 + $0x30] sm:$0xff] %v916_v8   ;;  %976 = vst [vmem:[%s1202_s13 + $0x70] sm:$0xff] %v956_v9  }
 0x11c PF: > { %s13_s12 = sadd.s32 1, %s1104_s12  }
 0x11d   : > { %p10_p4 = scmp.ge.s32.totalorder %s13_s12, 4  }
 0x11f   :  { %12 = sbr.rel (!%p10_p4) target bundleno = 1 (0x1), region = 62 }

// kernel: music_bin_encoder_forward.3
= control target key start
LH: loop header
LB: loop body
LE: loop exit
PB: predicated region body
PF: predicated region fallthrough
CT: control target
= control target key end

     0   :  { %8 = vsyncpa [#allocation4], 0  ;;  %s1003_s0 = inlined_call_operand.vmem [shape: bf16[128,256], index: 0, kind: input, shape index: {}]   ;;  %s1004_s1 = inlined_call_operand.vmem [shape: bf16[256,128], index: 1, kind: input, shape index: {}]   ;;  %s1005_s2 = inlined_call_operand.vmem [shape: f32[1,128], index: 2, kind: input, shape index: {}]   ;;  %s1006_s3 = inlined_call_operand.hbm [shape: f32[2,1,128], index: 3, kind: output, shape index: {}]  }
   0x1   :  { %10 = vsyncpa [#allocation4 + $0x1], 0  ;;  %s831_s12 = smov 0   ;;  %s833_s13 = smov 0  }
   0x2   :  { %s835_s14 = smov 0   ;;  %s837_s15 = smov 0  }
   0x3   :  { %s839_s16 = smov 0   ;;  %s841_s17 = smov 0  }
   0x4 LB: > { %s552_s18 = sadd.s32 4294967295, %s807_s17   ;;  %s553_s19 = sadd.s32 4294967294, %s807_s17   ;;  %s807_s17 = sphi %s841_s17, %s16_s17   ;;  %s803_s16 = sphi %s839_s16, %s1013_s16   ;;  %s799_s15 = sphi %s837_s15, %s1012_s15   ;;  %s795_s14 = sphi %s835_s14, %s1011_s14   ;;  %s791_s13 = sphi %s833_s13, %s1010_s13   ;;  %s787_s12 = sphi %s831_s12, %s1009_s12  }
   0x5   : > { %s28_s20 = sadd.s32 1, %s803_s16  ;;  %s105_s21 = sadd.s32 1, %s795_s14 }
   0x6   : > { %p30_p0 = scmp.ge.s32.totalorder %s28_s20, 2  ;;  %p115_p1 = scmp.ne.s32.totalorder %s795_s14, %s791_s13 }
   0x7   : > { %p116_p2 = scmp.eq.s32.totalorder %s552_s18, 1  ;;  %p121_p3 = scmp.ne.s32.totalorder %s791_s13, %s787_s12 }
   0x8   : > { %s1015_s20 = smov (%p30_p0, %s28_s20), 0  ;;  %p122_p5 = scmp.eq.s32.totalorder %s553_s19, 1 }
   0x9   : > { %p871_p4 = por %p116_p2, %p115_p1  ;;  %s102_s23 = ssub.s32 %s803_s16, %s1015_s20 }
   0xa   : > { %p556_p6 = scmp.ge.s32.totalorder %s807_s17, 1  ;;  %p103_p7 = scmp.eq.s32.totalorder %s102_s23, 0 }
   0xb   : > { %p878_p8 = por %p122_p5, %p121_p3  ;;  %p158_p9 = scmp.lt.s32.totalorder %s807_s17, 3 }
   0xc   : > { %s884_s25 = scalar_select %p103_p7, %s795_s14, %s105_s21  }
   0xd   : > { %p159_p10 = pnand %p556_p6, %p158_p9 }
   0xe   : > { %v701_v0 = vld [vmem:[%s1004_s1 + $0x40] sm:$0xff] (!%p159_p10)   ;;  %s557_s28 = sshll.u32 (!%p159_p10), %s799_s15, 3  ;;  %v703_v2 = vld [vmem:[%s1004_s1 + $0x48] sm:$0xff] (!%p159_p10)   ;;  %v705_v4 = vld [vmem:[%s1004_s1 + $0x50] sm:$0xff] (!%p159_p10)   ;;  %v809_v24 = vmov (!%p159_p10), 0.0   ;;  %s585_s6 = sshll.u32 (!%p159_p10), %s799_s15, 4 }
   0xf   : > { %162 = sbr.rel (%p159_p10) target bundleno = 324 (0x144), region = 32  ;;  %v702_v1 = vld [vmem:[%s1004_s1] sm:$0xff] (!%p159_p10)   ;;  %589 = vmatprep.subr.bf16.mxu0 (!%p159_p10), %v701_v0  ;;  %629 = vmatprep.subr.bf16.mxu1 (!%p159_p10), %v701_v0  ;;  %v704_v3 = vld [vmem:[%s1004_s1 + $0x8] sm:$0xff] (!%p159_p10)   ;;  %p185_p11 = scmp.lt.s32.totalorder (!%p159_p10), %s557_s28, 15  ;;  %v706_v5 = vld [vmem:[%s1004_s1 + $0x10] sm:$0xff] (!%p159_p10)  }
  0x10   : > { %590 = vmatpush3.bf16.msra.mxu0 (!%p159_p10), %v702_v1  ;;  %637 = vmatpush3.bf16.msra.mxu1 (!%p159_p10), %v702_v1  ;;  %v707_v6 = vld [vmem:[%s1004_s1 + $0x58] sm:$0xff] (!%p159_p10)   ;;  %v709_v8 = vld [vmem:[%s1004_s1 + $0x60] sm:$0xff] (!%p159_p10)   ;;  %v711_v10 = vld [vmem:[%s1004_s1 + $0x68] sm:$0xff] (!%p159_p10)   ;;  %197 = vst [vmem:[#allocation2] sm:$0x1] (!%p159_p10), %v809_v24  ;;  %s956_s10 = scalar_lea.hbm (!%p159_p10), %s1006_s3, %s585_s6  ;;  %s810_s15 = smov (!%p159_p10), [#allocation3]  }
  0x11   : > { %591 = vmatprep.subr.bf16.mxu0 (!%p159_p10), %v703_v2  ;;  %630 = vmatprep.subr.bf16.mxu1 (!%p159_p10), %v703_v2  ;;  %v708_v7 = vld [vmem:[%s1004_s1 + $0x18] sm:$0xff] (!%p159_p10)   ;;  %v710_v9 = vld [vmem:[%s1004_s1 + $0x20] sm:$0xff] (!%p159_p10)   ;;  %v712_v13 = vld [vmem:[%s1004_s1 + $0x28] sm:$0xff] (!%p159_p10)   ;;  %s733_s19 = sshll.u32 (!%p159_p10), %s810_s15, 4  ;;  %s734_s19 = int_to_ptr.vmem [resolvable:$false] %s733_s19 }
  0x12   : > { %v713_v14 = vld [vmem:[%s1004_s1 + $0x70] sm:$0xff] (!%p159_p10)   ;;  %v715_v16 = vld [vmem:[%s1004_s1 + $0x78] sm:$0xff] (!%p159_p10)   ;;  %v560_v27 = vld [vmem:[%s1005_s2] ss:$0 sm:$0xff] (!%p159_p10)  ;;  %s735_s21 = scalar_lea.vmem (!%p159_p10), %s734_s19, 32 }
  0x13   : > { %v714_v15 = vld [vmem:[%s1004_s1 + $0x30] sm:$0xff] (!%p159_p10)   ;;  %v716_v17 = vld [vmem:[%s1004_s1 + $0x38] sm:$0xff] (!%p159_p10)  }
  0x14   : > { %592 = vmatpush3.bf16.msra.mxu0 (!%p159_p10), %v704_v3  ;;  %638 = vmatpush3.bf16.msra.mxu1 (!%p159_p10), %v704_v3 }
  0x15   : > { %593 = vmatprep.subr.bf16.mxu0 (!%p159_p10), %v705_v4  ;;  %631 = vmatprep.subr.bf16.mxu1 (!%p159_p10), %v705_v4 }
  0x16   : > { %s1017_s28 = smov (!%p185_p11, %s557_s28), 15 }
  0x17   : > { %s588_s26 = sshll.u32 %s1017_s28, 3 }
  0x18   : > { %594 = vmatpush3.bf16.msra.mxu0 %v706_v5  ;;  %639 = vmatpush3.bf16.msra.mxu1 %v706_v5  ;;  %s917_s5 = scalar_lea.vmem %s1003_s0, %s588_s26 }
  0x19   : > { %595 = vmatprep.subr.bf16.mxu0 %v707_v6  ;;  %632 = vmatprep.subr.bf16.mxu1 %v707_v6  ;;  %v719_v11 = vld [vmem:[%s917_s5 + $0x4] ss:$8 sps:$4 sm:$0xff]   ;;  %v717_v18 = vld [vmem:[%s917_s5] ss:$8 sps:$4 sm:$0xff]   ;;  %v723_v20 = vld [vmem:[%s917_s5 + $0x14] ss:$8 sps:$4 sm:$0xff]  }
  0x1a   : > { %v722_v12 = vld [vmem:[%s917_s5 + $0x24] ss:$8 sps:$4 sm:$0xff]   ;;  %413 = vmatprep.mubr.bf16.mxu0 %v719_v11  ;;  %v720_v19 = vld [vmem:[%s917_s5 + $0x20] ss:$8 sps:$4 sm:$0xff]   ;;  %v726_v21 = vld [vmem:[%s917_s5 + $0x34] ss:$8 sps:$4 sm:$0xff]  }
  0x1b   : > { %429 = vmatprep.mubr.bf16.mxu1 %v722_v12  ;;  %v725_v22 = vld [vmem:[%s917_s5 + $0x10] ss:$8 sps:$4 sm:$0xff]  }
  0x1c   : > { %596 = vmatpush3.bf16.msra.mxu0 %v708_v7  ;;  %640 = vmatpush3.bf16.msra.mxu1 %v708_v7  ;;  %v728_v23 = vld [vmem:[%s917_s5 + $0x30] ss:$8 sps:$4 sm:$0xff]   ;;  %s181_s5 = sand.u32 1, %s791_s13  }
  0x1d   : > { %597 = vmatprep.subr.bf16.mxu0 %v709_v8  ;;  %633 = vmatprep.subr.bf16.mxu1 %v709_v8  ;;  %s182_s7 = scalar_lea.vmem [#allocation3], %s181_s5  ;;  %s477_s11 = scalar_lea.sflag [#allocation4], %s181_s5 }
  0x1e   : > { %s489_s28 = sshll.u32 %s182_s7, 4  ;;  %s958_s28 = int_to_ptr.vmem [resolvable:$true] %s489_s28 }
  0x1f   : > { %s729_s18 = scalar_lea.vmem %s958_s28, 16  ;;  %p736_p1 = scmp.lt.s32.totalorder %s958_s28, %s734_s19 }
  0x20   : > { %598 = vmatpush3.bf16.msra.mxu0 %v710_v9  ;;  %641 = vmatpush3.bf16.msra.mxu1 %v710_v9  ;;  %p730_p12 = scmp.ne.s32.totalorder %s958_s28, %s729_s18  ;;  %p737_p2 = scmp.lt.s32.totalorder %s735_s21, %s729_s18 }
  0x21   : > { %599 = vmatprep.subr.bf16.mxu0 %v711_v10  ;;  %634 = vmatprep.subr.bf16.mxu1 %v711_v10 }
  0x22   : > { %p731_p13 = pnand %p730_p12, %p871_p4  ;;  %p738_p3 = por %p737_p2, %p736_p1 }
  0x24   : > { %600 = vmatpush3.bf16.msra.mxu0 %v712_v13  ;;  %642 = vmatpush3.bf16.msra.mxu1 %v712_v13  ;;  %p732_p0 = pneg %p731_p13 }
  0x25   : > { %601 = vmatprep.subr.bf16.mxu0 %v713_v14  ;;  %635 = vmatprep.subr.bf16.mxu1 %v713_v14  ;;  %v454_v14 = vld [vmem:[#allocation2] sm:$0x1] }
  0x26   : > { %p739_p5 = pnand %p738_p3, %p732_p0 }
  0x28   : > { %602 = vmatpush3.bf16.msra.mxu0 %v714_v15  ;;  %643 = vmatpush3.bf16.msra.mxu1 %v714_v15 }
  0x29   : > { %603 = vmatprep.subr.bf16.mxu0 %v715_v16  ;;  %636 = vmatprep.subr.bf16.mxu1 %v715_v16 }
  0x2c   : > { %604 = vmatpush3.bf16.msra.mxu0 %v716_v17  ;;  %644 = vmatpush3.bf16.msra.mxu1 %v716_v17 }
  0x2f   : > { %414 = vmatmul.mubr.bf16.vlgmr.msra.gmra.mrb[0].mxu0 %v717_v18  ;;  %430 = vmatmul.mubr.bf16.vlgmr.msra.gmra.mrb[0].mxu1 %v720_v19 }
  0x30   : > { %421 = vmatprep.mubr.bf16.mxu0 %v723_v20  ;;  %437 = vmatprep.mubr.bf16.mxu1 %v726_v21 }
  0x37   : > { %422 = vmatmul.mubr.bf16.gmra.mrb[4].mxu0 %v725_v22  ;;  %438 = vmatmul.mubr.bf16.gmra.mrb[4].mxu1 %v728_v23 }
 0x102   : > { %v605_v25 = vpop.f32.mrb[0].mxu0  ;;  %v617_v26 = vpop.f32.mrb[0].mxu1 }
 0x103   : > { %v606_v28 = vpop.f32.mrb[1].mxu0  ;;  %v618_v29 = vpop.f32.mrb[1].mxu1 }
 0x104   : > { %v607_v30 = vadd.f32 %v606_v28, %v605_v25  ;;  %v608_v31 = vpop.f32.mrb[2].mxu0  ;;  %v619_v32 = vadd.f32 %v618_v29, %v617_v26  ;;  %v620_v33 = vpop.f32.mrb[2].mxu1 }
 0x105   : > { %v609_v34 = vpop.f32.mrb[3].mxu0  ;;  %v621_v35 = vpop.f32.mrb[3].mxu1 }
 0x106   : > { %v416_v36 = vadd.f32 %v607_v30, %v560_v27  ;;  %v610_v37 = vadd.f32 %v609_v34, %v608_v31  ;;  %v622_v38 = vadd.f32 %v621_v35, %v620_v33  ;;  %v432_v56 = vadd.f32 %v619_v32, %v560_v27 }
 0x108   : > { %v419_v39 = vadd.f32 %v610_v37, %v560_v27  ;;  %v446_v40 = vmax.f32 %v416_v36, 0.0  ;;  %v435_v59 = vadd.f32 %v622_v38, %v560_v27  ;;  %v450_v63 = vmax.f32 %v432_v56, 0.0 }
 0x10a   : > { %v447_v41 = vmax.f32 %v419_v39, 0.0  ;;  %v611_v42 = vpop.f32.mrb[4].mxu0  ;;  %v623_v43 = vpop.f32.mrb[4].mxu1  ;;  %v451_v1 = vmax.f32 %v435_v59, 0.0 }
 0x10b   : > { %v612_v44 = vpop.f32.mrb[5].mxu0  ;;  %v624_v45 = vpop.f32.mrb[5].mxu1 }
 0x10c   : > { %v455_v46 = vadd.f32 %v447_v41, %v446_v40  ;;  %v613_v47 = vadd.f32 %v612_v44, %v611_v42  ;;  %v614_v48 = vpop.f32.mrb[6].mxu0  ;;  %v625_v49 = vadd.f32 %v624_v45, %v623_v43  ;;  %v626_v50 = vpop.f32.mrb[6].mxu1 }
 0x10d   : > { %v615_v51 = vpop.f32.mrb[7].mxu0  ;;  %v627_v52 = vpop.f32.mrb[7].mxu1 }
 0x10e   : > { %v424_v53 = vadd.f32 %v613_v47, %v560_v27  ;;  %v616_v54 = vadd.f32 %v615_v51, %v614_v48  ;;  %v628_v55 = vadd.f32 %v627_v52, %v626_v50  ;;  %v440_v62 = vadd.f32 %v625_v49, %v560_v27 }
 0x110   : > { %v448_v57 = vmax.f32 %v424_v53, 0.0  ;;  %v427_v58 = vadd.f32 %v616_v54, %v560_v27  ;;  %v452_v3 = vmax.f32 %v440_v62, 0.0  ;;  %v443_v4 = vadd.f32 %v628_v55, %v560_v27 }
 0x112   : > { %v456_v60 = vadd.f32 %v455_v46, %v448_v57  ;;  %v449_v61 = vmax.f32 %v427_v58, 0.0  ;;  %v453_v7 = vmax.f32 %v443_v4, 0.0 }
 0x114   : > { %v457_v0 = vadd.f32 %v456_v60, %v449_v61 }
 0x116   : > { %v458_v2 = vadd.f32 %v457_v0, %v450_v63 }
 0x118   : > { %v459_v5 = vadd.f32 %v458_v2, %v451_v1 }
 0x11a   : > { %v460_v6 = vadd.f32 %v459_v5, %v452_v3 }
 0x11c   : > { %v461_v8 = vadd.f32 %v460_v6, %v453_v7 }
 0x11e   : > { %v462_v9 = vrot.slane %v461_v8, 4 }
 0x120   : > { %v463_v10 = vadd.f32 %v462_v9, %v461_v8 }
 0x122   : > { %v464_v11 = vrot.slane %v463_v10, 2 }
 0x124   : > { %v465_v12 = vadd.f32 %v464_v11, %v463_v10 }
 0x126   : > { %v466_v13 = vrot.slane %v465_v12, 1 }
 0x128   : > { %v467_v15 = vadd.f32 %v466_v13, %v465_v12 }
 0x12a   : > { %v468_v16 = vadd.f32 %v467_v15, %v454_v14 }
 0x12c   : > { %469 = vst [vmem:[#allocation2] sm:$0x1] %v468_v16 }
 0x133   : > { %v473_v17 = vld [vmem:[#allocation2] sm:$0x1] }
 0x134   : > { %v474_v18 = vmul.f32 0.015625, %v473_v17 }
 0x136   : > { %475 = vst [vmem:[%s182_s7] sm:$0x1] %v474_v18 }
 0x137   : > { %742 = shalt.err (!%p739_p5)
}
 0x138   : > { %s743_s23 = scalar_lea.hbm %s956_s10, 16  ;;  %s747_s29 = scalar_lea.hbm %s1006_s3, 32 }
 0x139   : > { %p744_p6 = scmp.ne.s32.totalorder %s956_s10, %s743_s23  ;;  %p748_p10 = scmp.lt.u32.totalorder %s956_s10, %s1006_s3 }
 0x13a   : > { %p749_p11 = scmp.lt.u32.totalorder %s747_s29, %s743_s23  ;;  %p751_p13 = scmp.lt.u32.totalorder %s743_s23, %s956_s10 }
 0x13b   : > { %p745_p7 = pnand %p744_p6, %p871_p4 }
 0x13c   : > { %p750_p12 = por %p749_p11, %p748_p10 }
 0x13d   : > { %p746_p9 = pneg %p745_p7 }
 0x13e   : > { %p752_p0 = por %p751_p13, %p750_p12 }
 0x140   : > { %p753_p1 = pnand %p752_p0, %p746_p9 }
 0x142   : > { %756 = shalt.err (!%p753_p1)
}
 0x143   : > { %645 = dma.vmem_to_hbm [thread:$0]  (%p871_p4), %s958_s28, 16, %s956_s10, %s477_s11  }
 0x144 PF: > { %p651_p2 = scmp.ge.s32.totalorder %s807_s17, 2  ;;  %s501_s5 = sand.u32 1, %s787_s12  }
 0x145   : > { %s502_s6 = scalar_lea.sflag [#allocation4], %s501_s5 }
 0x146   : > { %p648_p3 = pnand %p651_p2, %p878_p8 }
 0x148   : > { %782 = dma.done.wait (!%p648_p3), %s502_s6, 16  }
 0x149   : > { %784 = vsyncadd (!%p648_p3), %s502_s6, 4294967280  ;;  %s16_s17 = sadd.s32 1, %s807_s17   ;;  %s1009_s12 = smov %s791_s13 }
 0x14a   : > { %p13_p5 = scmp.ge.s32.totalorder %s16_s17, 4   ;;  %s1010_s13 = smov %s795_s14 }
 0x14b   : > { %s1011_s14 = smov %s884_s25  ;;  %s1012_s15 = smov %s803_s16 }
 0x14c   : > { %s1013_s16 = smov %s1015_s20  ;;  %15 = sbr.rel (!%p13_p5) target bundleno = 4 (0x4), region = 75 }
 0x153   :  { %506 = vsyncpa [#allocation4], 1 }
 0x154   :  { %508 = vsyncpa [#allocation4 + $0x1], 1 }

</bundles_post_ra>
